<compile_context>
chip_gen: v7x
topology: tpu7x:2x2x1
jax: 0.10.0
libtpu: 0.0.40
codegen_flags: <defaults>
</compile_context>

<pallas_src>
import functools

import jax
import jax.numpy as jnp
from jax.experimental import pallas as pl
from jax.experimental.pallas import tpu as pltpu


# ----------------------------- fused GRU kernel -----------------------------

def _gru_seq_kernel(x_ref, w1h_ref, w1x_ref, b1_ref, w2h_ref, w2x_ref, b2_ref,
                    o_ref, h_ref, *, split):
    """One grid step == one timestep of the GRU recurrence.

    x_ref   : (1, B, N)        input at timestep t
    w1h_ref : (N*H, N*2H)      block-diagonal W1[1:, :]
    w1x_ref : (N,   N*2H)      block-row      W1[0, :]
    b1_ref  : (1,   N*2H)      b1 tiled per node
    w2h_ref : (N*H, N*H)       block-diagonal W2[1:, :]
    w2x_ref : (N,   N*H)       block-row      W2[0, :]
    b2_ref  : (1,   N*H)       b2 tiled per node
    o_ref   : (B,   N*H)       last hidden state (lane-dense output)
    h_ref   : (B,   N*H) f32   VMEM-resident hidden-state carry
    """
    t = pl.program_id(0)

    @pl.when(t == 0)
    def _init():
        h_ref[...] = jnp.zeros_like(h_ref)

    x_t = x_ref[0].astype(jnp.float32)          # (B, N)
    h = h_ref[...]                              # (B, N*H) f32

    # linear1 (+ bias) + sigmoid, entirely in flat lane space.
    z1 = (jnp.dot(h, w1h_ref[...], preferred_element_type=jnp.float32)
          + jnp.dot(x_t, w1x_ref[...], preferred_element_type=jnp.float32)
          + b1_ref[...])
    conc = jax.nn.sigmoid(z1)                   # (B, N*2H)

    # torch.chunk(conc, 2, dim=1) on the flattened (B, N*2H) tensor.
    r = conc[:, :split]                         # (B, N*H)
    u = conc[:, split:]                         # (B, N*H)
    rh = r * h

    # linear2 (+ bias) + tanh.
    z2 = (jnp.dot(rh, w2h_ref[...], preferred_element_type=jnp.float32)
          + jnp.dot(x_t, w2x_ref[...], preferred_element_type=jnp.float32)
          + b2_ref[...])
    c = jnp.tanh(z2)                            # (B, N*H)

    h_new = u * h + (1.0 - u) * c
    h_ref[...] = h_new
    o_ref[...] = h_new.astype(o_ref.dtype)


# --------------------------- wrapper / param prep ---------------------------

def _block_diag(w, n):
    """(K, O) -> (n*K, n*O) with w repeated on the block diagonal."""
    k, o = w.shape
    eye = jnp.eye(n, dtype=w.dtype)
    return jnp.einsum("ij,ko->ikjo", eye, w).reshape(n * k, n * o)


def _block_row(v, n):
    """(O,) -> (n, n*O): row i holds v in columns [i*O, (i+1)*O)."""
    o = v.shape[0]
    eye = jnp.eye(n, dtype=v.dtype)
    return jnp.einsum("ij,o->ijo", eye, v).reshape(n, n * o)


@jax.jit
def gru_forward(inputs, params):
    """inputs: (B, T, N) -> last output (B, N, H), matching the PyTorch GRU."""
    B, T, N = inputs.shape
    W1, b1 = params["W1"], params["b1"]
    W2, b2 = params["W2"], params["b2"]
    H = W1.shape[0] - 1
    f32 = jnp.float32

    # Layout plumbing (wrapper-side, once per call): time-major inputs and
    # block-replicated weights so the kernel needs no concat/reshape/gather.
    x_tbn = jnp.transpose(inputs, (1, 0, 2))                    # (T, B, N)
    w1h = _block_diag(W1[1:, :].astype(f32), N)                 # (N*H, N*2H)
    w1x = _block_row(W1[0, :].astype(f32), N)                   # (N,   N*2H)
    b1t = jnp.tile(b1.astype(f32), N).reshape(1, N * 2 * H)
    w2h = _block_diag(W2[1:, :].astype(f32), N)                 # (N*H, N*H)
    w2x = _block_row(W2[0, :].astype(f32), N)                   # (N,   N*H)
    b2t = jnp.tile(b2.astype(f32), N).reshape(1, N * H)

    kernel = functools.partial(_gru_seq_kernel, split=N * H)
    h_last = pl.pallas_call(
        kernel,
        out_shape=jax.ShapeDtypeStruct((B, N * H), inputs.dtype),
        grid=(T,),
        in_specs=[
            pl.BlockSpec((1, B, N), lambda t: (t, 0, 0)),             # x[t]
            pl.BlockSpec((N * H, N * 2 * H), lambda t: (0, 0)),       # W1h
            pl.BlockSpec((N, N * 2 * H), lambda t: (0, 0)),           # W1x
            pl.BlockSpec((1, N * 2 * H), lambda t: (0, 0)),           # b1
            pl.BlockSpec((N * H, N * H), lambda t: (0, 0)),           # W2h
            pl.BlockSpec((N, N * H), lambda t: (0, 0)),               # W2x
            pl.BlockSpec((1, N * H), lambda t: (0, 0)),               # b2
        ],
        out_specs=pl.BlockSpec((B, N * H), lambda t: (0, 0)),
        scratch_shapes=[pltpu.VMEM((B, N * H), jnp.float32)],
        compiler_params=pltpu.CompilerParams(
            dimension_semantics=("arbitrary",)),
    )(x_tbn, w1h, w1x, b1t, w2h, w2x, b2t)

    return h_last.reshape(B, N, H)


# ------------------------------ parameter init ------------------------------

def xavier_uniform(key, shape, dtype=jnp.float32):
    fan_in, fan_out = shape
    a = (6.0 / (fan_in + fan_out)) ** 0.5
    return jax.random.uniform(key, shape, dtype=dtype, minval=-a, maxval=a)


def init_gru_params(key, num_nodes, hidden_dim):
    del num_nodes  # weights are shared across nodes, as in the PyTorch module
    k1, k2 = jax.random.split(key)
    H = hidden_dim
    return {
        "W1": xavier_uniform(k1, (H + 1, 2 * H)),          # GRULinear(H, 2H, bias=1.0)
        "b1": jnp.full((2 * H,), 1.0, dtype=jnp.float32),
        "W2": xavier_uniform(k2, (H + 1, H)),              # GRULinear(H, H, bias=0.0)
        "b2": jnp.zeros((H,), dtype=jnp.float32),
    }


# ------------------------ pure-JAX reference (checks) ------------------------

def gru_forward_reference(inputs, params):
    """Direct transcription of the PyTorch module (concat / matmul / chunk)."""
    B, T, N = inputs.shape
    W1, b1, W2, b2 = params["W1"], params["b1"], params["W2"], params["b2"]
    H = W1.shape[0] - 1

    def lin(x, h_flat, W, b, out_dim):
        hid = h_flat.reshape(B, N, H)
        cat = jnp.concatenate([x[:, :, None], hid], axis=2).reshape(B * N, H + 1)
        return (cat @ W + b).reshape(B, N * out_dim)

    h = jnp.zeros((B, N * H), dtype=inputs.dtype)
    for t in range(T):
        x = inputs[:, t, :]
        conc = jax.nn.sigmoid(lin(x, h, W1, b1, 2 * H))
        r, u = jnp.split(conc, 2, axis=1)
        c = jnp.tanh(lin(x, r * h, W2, b2, H))
        h = u * h + (1.0 - u) * c
    return h.reshape(B, N, H)


# ----------------------------------- main ------------------------------------

if __name__ == "__main__":
    key = jax.random.PRNGKey(0)
    k_param, k_input = jax.random.split(key)

    batch, seq_len, num_nodes, hidden_dim = 2, 8, 8, 32
    params = init_gru_params(k_param, num_nodes, hidden_dim)
    inputs = jax.random.normal(
        k_input, (batch, seq_len, num_nodes), dtype=jnp.float32)

    out = gru_forward(inputs, params)
    out = jax.block_until_ready(out)

    assert out.shape == (batch, num_nodes, hidden_dim), out.shape
    assert bool(jnp.all(jnp.isfinite(out)))

    ref = gru_forward_reference(inputs, params)
    max_err = float(jnp.max(jnp.abs(out - ref)))
    assert max_err < 1e-4, f"max |pallas - ref| = {max_err}"

    print("KERNEL_OK")
</pallas_src>

<mosaic_0001>
module attributes {stable_mosaic.version = 11 : i64} {
  func.func @_gru_seq_kernel(%arg0: i32, %arg1: memref<1x2x8xf32, #tpu.memory_space<vmem>>, %arg2: memref<256x512xf32, #tpu.memory_space<vmem>>, %arg3: memref<8x512xf32, #tpu.memory_space<vmem>>, %arg4: memref<1x512xf32, #tpu.memory_space<vmem>>, %arg5: memref<256x256xf32, #tpu.memory_space<vmem>>, %arg6: memref<8x256xf32, #tpu.memory_space<vmem>>, %arg7: memref<1x256xf32, #tpu.memory_space<vmem>>, %arg8: memref<2x256xf32, #tpu.memory_space<vmem>>, %arg9: memref<2x256xf32, #tpu.memory_space<vmem>>) attributes {dimension_semantics = [#tpu.dimension_semantics<arbitrary>], iteration_bounds = array<i64: 8>, scalar_prefetch = 0 : i64, scratch_operands = 1 : i64, tpu.core_type = #tpu.core_type<tc>, window_params = [{transform_indices = @transform_0, window_bounds = array<i64: 1, 2, 8>}, {pipeline_mode = #tpu.pipeline_mode<synchronous>, transform_indices = @transform_1, window_bounds = array<i64: 256, 512>}, {pipeline_mode = #tpu.pipeline_mode<synchronous>, transform_indices = @transform_2, window_bounds = array<i64: 8, 512>}, {pipeline_mode = #tpu.pipeline_mode<synchronous>, transform_indices = @transform_3, window_bounds = array<i64: 1, 512>}, {pipeline_mode = #tpu.pipeline_mode<synchronous>, transform_indices = @transform_4, window_bounds = array<i64: 256, 256>}, {pipeline_mode = #tpu.pipeline_mode<synchronous>, transform_indices = @transform_5, window_bounds = array<i64: 8, 256>}, {pipeline_mode = #tpu.pipeline_mode<synchronous>, transform_indices = @transform_6, window_bounds = array<i64: 1, 256>}, {pipeline_mode = #tpu.pipeline_mode<synchronous>, transform_indices = @transform_7, window_bounds = array<i64: 2, 256>}]} {
    %c0_i32 = arith.constant 0 : i32
    %0 = arith.cmpi eq, %arg0, %c0_i32 : i32
    %1 = arith.extui %0 : i1 to i32
    %c0_i32_0 = arith.constant 0 : i32
    %2 = arith.cmpi ne, %1, %c0_i32_0 : i32
    scf.if %2 {
      %cst_26 = arith.constant 0.000000e+00 : f32
      %38 = vector.broadcast %cst_26 : f32 to vector<2x256xf32>
      %c0_27 = arith.constant 0 : index
      %c0_28 = arith.constant 0 : index
      %39 = vector.load %arg9[%c0_27, %c0_28] : memref<2x256xf32, #tpu.memory_space<vmem>>, vector<2x256xf32>
      tpu.vector_store %arg9[%c0_27, %c0_28], %38 {strides = array<i32>} : memref<2x256xf32, #tpu.memory_space<vmem>>, vector<2x256xf32>,
    } else {
    }
    %c0 = arith.constant 0 : index
    %c0_1 = arith.constant 0 : index
    %c0_2 = arith.constant 0 : index
    %3 = vector.load %arg1[%c0, %c0_1, %c0_2] : memref<1x2x8xf32, #tpu.memory_space<vmem>>, vector<1x2x8xf32>
    %4 = vector.shape_cast %3 : vector<1x2x8xf32> to vector<2x8xf32>
    %c0_3 = arith.constant 0 : index
    %c0_4 = arith.constant 0 : index
    %5 = vector.load %arg9[%c0_3, %c0_4] : memref<2x256xf32, #tpu.memory_space<vmem>>, vector<2x256xf32>
    %c0_5 = arith.constant 0 : index
    %c0_6 = arith.constant 0 : index
    %6 = vector.load %arg2[%c0_5, %c0_6] : memref<256x512xf32, #tpu.memory_space<vmem>>, vector<256x512xf32>
    %cst = arith.constant dense<0.000000e+00> : vector<2x512xf32>
    %7 = tpu.matmul %5, %6, %cst {dimension_numbers = #tpu.dot_dimension_numbers<[1], [0], [0], [1], [0, 0, 1, 1], [], []>} : vector<2x256xf32>, vector<256x512xf32>, vector<2x512xf32> -> vector<2x512xf32>
    %c0_7 = arith.constant 0 : index
    %c0_8 = arith.constant 0 : index
    %8 = vector.load %arg3[%c0_7, %c0_8] : memref<8x512xf32, #tpu.memory_space<vmem>>, vector<8x512xf32>
    %cst_9 = arith.constant dense<0.000000e+00> : vector<2x512xf32>
    %9 = tpu.matmul %4, %8, %cst_9 {dimension_numbers = #tpu.dot_dimension_numbers<[1], [0], [0], [1], [0, 0, 1, 1], [], []>} : vector<2x8xf32>, vector<8x512xf32>, vector<2x512xf32> -> vector<2x512xf32>
    %10 = arith.addf %7, %9 : vector<2x512xf32>
    %c0_10 = arith.constant 0 : index
    %c0_11 = arith.constant 0 : index
    %11 = vector.load %arg4[%c0_10, %c0_11] : memref<1x512xf32, #tpu.memory_space<vmem>>, vector<1x512xf32>
    %12 = vector.broadcast %11 : vector<1x512xf32> to vector<2x512xf32>
    %13 = arith.addf %10, %12 : vector<2x512xf32>
    %14 = arith.negf %13 : vector<2x512xf32>
    %15 = math.exp %14 : vector<2x512xf32>
    %cst_12 = arith.constant 1.000000e+00 : f32
    %16 = vector.broadcast %cst_12 : f32 to vector<2x512xf32>
    %17 = arith.addf %16, %15 : vector<2x512xf32>
    %18 = arith.divf %16, %17 : vector<2x512xf32>
    %19 = vector.extract_strided_slice %18 {offsets = [0, 0], sizes = [2, 256], strides = [1, 1]} : vector<2x512xf32> to vector<2x256xf32>
    %20 = vector.extract_strided_slice %18 {offsets = [0, 256], sizes = [2, 256], strides = [1, 1]} : vector<2x512xf32> to vector<2x256xf32>
    %21 = arith.mulf %19, %5 : vector<2x256xf32>
    %c0_13 = arith.constant 0 : index
    %c0_14 = arith.constant 0 : index
    %22 = vector.load %arg5[%c0_13, %c0_14] : memref<256x256xf32, #tpu.memory_space<vmem>>, vector<256x256xf32>
    %cst_15 = arith.constant dense<0.000000e+00> : vector<2x256xf32>
    %23 = tpu.matmul %21, %22, %cst_15 {dimension_numbers = #tpu.dot_dimension_numbers<[1], [0], [0], [1], [0, 0, 1, 1], [], []>} : vector<2x256xf32>, vector<256x256xf32>, vector<2x256xf32> -> vector<2x256xf32>
    %c0_16 = arith.constant 0 : index
    %c0_17 = arith.constant 0 : index
    %24 = vector.load %arg6[%c0_16, %c0_17] : memref<8x256xf32, #tpu.memory_space<vmem>>, vector<8x256xf32>
    %cst_18 = arith.constant dense<0.000000e+00> : vector<2x256xf32>
    %25 = tpu.matmul %4, %24, %cst_18 {dimension_numbers = #tpu.dot_dimension_numbers<[1], [0], [0], [1], [0, 0, 1, 1], [], []>} : vector<2x8xf32>, vector<8x256xf32>, vector<2x256xf32> -> vector<2x256xf32>
    %26 = arith.addf %23, %25 : vector<2x256xf32>
    %c0_19 = arith.constant 0 : index
    %c0_20 = arith.constant 0 : index
    %27 = vector.load %arg7[%c0_19, %c0_20] : memref<1x256xf32, #tpu.memory_space<vmem>>, vector<1x256xf32>
    %28 = vector.broadcast %27 : vector<1x256xf32> to vector<2x256xf32>
    %29 = arith.addf %26, %28 : vector<2x256xf32>
    %30 = math.tanh %29 : vector<2x256xf32>
    %31 = arith.mulf %20, %5 : vector<2x256xf32>
    %cst_21 = arith.constant 1.000000e+00 : f32
    %32 = vector.broadcast %cst_21 : f32 to vector<2x256xf32>
    %33 = arith.subf %32, %20 : vector<2x256xf32>
    %34 = arith.mulf %33, %30 : vector<2x256xf32>
    %35 = arith.addf %31, %34 : vector<2x256xf32>
    %c0_22 = arith.constant 0 : index
    %c0_23 = arith.constant 0 : index
    %36 = vector.load %arg9[%c0_22, %c0_23] : memref<2x256xf32, #tpu.memory_space<vmem>>, vector<2x256xf32>
    tpu.vector_store %arg9[%c0_22, %c0_23], %35 {strides = array<i32>} : memref<2x256xf32, #tpu.memory_space<vmem>>, vector<2x256xf32>,
    %c0_24 = arith.constant 0 : index
    %c0_25 = arith.constant 0 : index
    %37 = vector.load %arg8[%c0_24, %c0_25] : memref<2x256xf32, #tpu.memory_space<vmem>>, vector<2x256xf32>
    tpu.vector_store %arg8[%c0_24, %c0_25], %35 {strides = array<i32>} : memref<2x256xf32, #tpu.memory_space<vmem>>, vector<2x256xf32>,
    return
  }
  func.func @transform_0(%arg0: i32) -> (i32, i32, i32) {
    %c0_i32 = arith.constant 0 : i32
    %c0_i32_0 = arith.constant 0 : i32
    %c0_i32_1 = arith.constant 0 : i32
    return %arg0, %c0_i32, %c0_i32_0 : i32, i32, i32
  }
  func.func @transform_1(%arg0: i32) -> (i32, i32) {
    %c0_i32 = arith.constant 0 : i32
    %c0_i32_0 = arith.constant 0 : i32
    %c0_i32_1 = arith.constant 0 : i32
    return %c0_i32, %c0_i32_0 : i32, i32
  }
  func.func @transform_2(%arg0: i32) -> (i32, i32) {
    %c0_i32 = arith.constant 0 : i32
    %c0_i32_0 = arith.constant 0 : i32
    %c0_i32_1 = arith.constant 0 : i32
    return %c0_i32, %c0_i32_0 : i32, i32
  }
  func.func @transform_3(%arg0: i32) -> (i32, i32) {
    %c0_i32 = arith.constant 0 : i32
    %c0_i32_0 = arith.constant 0 : i32
    %c0_i32_1 = arith.constant 0 : i32
    return %c0_i32, %c0_i32_0 : i32, i32
  }
  func.func @transform_4(%arg0: i32) -> (i32, i32) {
    %c0_i32 = arith.constant 0 : i32
    %c0_i32_0 = arith.constant 0 : i32
    %c0_i32_1 = arith.constant 0 : i32
    return %c0_i32, %c0_i32_0 : i32, i32
  }
  func.func @transform_5(%arg0: i32) -> (i32, i32) {
    %c0_i32 = arith.constant 0 : i32
    %c0_i32_0 = arith.constant 0 : i32
    %c0_i32_1 = arith.constant 0 : i32
    return %c0_i32, %c0_i32_0 : i32, i32
  }
  func.func @transform_6(%arg0: i32) -> (i32, i32) {
    %c0_i32 = arith.constant 0 : i32
    %c0_i32_0 = arith.constant 0 : i32
    %c0_i32_1 = arith.constant 0 : i32
    return %c0_i32, %c0_i32_0 : i32, i32
  }
  func.func @transform_7(%arg0: i32) -> (i32, i32) {
    %c0_i32 = arith.constant 0 : i32
    %c0_i32_0 = arith.constant 0 : i32
    %c0_i32_1 = arith.constant 0 : i32
    return %c0_i32, %c0_i32_0 : i32, i32
  }
}

</mosaic_0001>

<bundles_post_ra>
// kernel: tile.14
= control target key start
LH: loop header
LB: loop body
LE: loop exit
PB: predicated region body
PF: predicated region fallthrough
CT: control target
= control target key end

     0   :  { %vm3_vm0 = vcmask 523264   ;;  %s41_s8 = smov 64   ;;  %vm9_vm1 = vcmask 1048064   ;;  %s70_s0 = inlined_call_operand.vmem [shape: f32[8,64], index: 0, kind: input, shape index: {}]   ;;  %s71_s1 = inlined_call_operand.vmem [shape: f32[1,512], index: 1, kind: output, shape index: {}]  }
   0x1   :  { %v36_v0 = vld [vmem:[%s70_s0 + $0x1] ss:$2 sm:$0xf]   ;;  %v2_v1 = vld [vmem:[%s70_s0] ss:$2 sm:$0xf]  }
   0x2   :  { %7 = vrot.lane.b32.xlu0 %v36_v0, %s41_s8  ;;  %4 = vst.msk [vmem:[#allocation0] ss:$8 sm:$0xf] %vm3_vm0, %v2_v1  }
  0x74   :  { %v8_v2 = vpop.permute.xlu0 %7  }
  0x75   :  { %10 = vst.msk [vmem:[#allocation0] ss:$8 sm:$0xf] %vm9_vm1, %v8_v2  }
  0x7c   :  { %v14_v3 = vld [vmem:[#allocation0] sm:$0x1]  ;;  %v18_v4 = vld [vmem:[#allocation0 + $0x8] sm:$0x1]  ;;  %v23_v5 = vld [vmem:[#allocation0 + $0x10] sm:$0x1] }
  0x7d   :  { %16 = vst [vmem:[%s71_s1] sm:$0x1] %v14_v3  ;;  %37 = vst [vmem:[%s71_s1 + $0x1] sm:$0x1] %v18_v4  ;;  %v29_v6 = vld [vmem:[#allocation0 + $0x18] sm:$0x1] }
  0x7e   :  { %38 = vst [vmem:[%s71_s1 + $0x2] sm:$0x1] %v23_v5  ;;  %39 = vst [vmem:[%s71_s1 + $0x3] sm:$0x1] %v29_v6 }

// kernel: tile.13
= control target key start
LH: loop header
LB: loop body
LE: loop exit
PB: predicated region body
PF: predicated region fallthrough
CT: control target
= control target key end

     0   :  { %s22_s0 = inlined_call_operand.vmem [shape: f32[64], index: 0, kind: input, shape index: {}]   ;;  %s23_s1 = inlined_call_operand.vmem [shape: f32[8,64], index: 1, kind: output, shape index: {}]  }
   0x1   :  { %v4_v0 = vld [vmem:[%s22_s0] ss:$0 sm:$0xff] }
   0x2   :  { %5 = vst [vmem:[%s23_s1] sm:$0xff] %v4_v0 }

// kernel: tile.18
= control target key start
LH: loop header
LB: loop body
LE: loop exit
PB: predicated region body
PF: predicated region fallthrough
CT: control target
= control target key end

     0   :  { %s22_s0 = inlined_call_operand.vmem [shape: f32[32], index: 0, kind: input, shape index: {}]   ;;  %s23_s1 = inlined_call_operand.vmem [shape: f32[8,32], index: 1, kind: output, shape index: {}]  }
   0x1   :  { %v4_v0 = vld [vmem:[%s22_s0] ss:$0 sm:$0xff] }
   0x2   :  { %5 = vst [vmem:[%s23_s1] sm:$0xff] %v4_v0 }

// kernel: tile.19
= control target key start
LH: loop header
LB: loop body
LE: loop exit
PB: predicated region body
PF: predicated region fallthrough
CT: control target
= control target key end

     0   :  { %s7_s6 = smov 3  ;;  %s14_s9 = smov 3  ;;  %vm4_vm0 = vcmask 261120   ;;  %vm11_vm1 = vcmask 1048320   ;;  %vm18_vm2 = vcmask 785920   ;;  %vm25_vm3 = vcmask 523520   ;;  %s76_s0 = inlined_call_operand.vmem [shape: f32[8,32], index: 0, kind: input, shape index: {}]   ;;  %s77_s1 = inlined_call_operand.vmem [shape: f32[1,256], index: 1, kind: output, shape index: {}]  }
   0x1   :  { %v38_v0 = vld [vmem:[%s76_s0 + $0x3] ss:$4 sm:%s7_s6]   ;;  %s45_s10 = smov 96   ;;  %s21_s11 = smov 3  ;;  %v39_v1 = vld [vmem:[%s76_s0 + $0x2] ss:$4 sm:%s14_s9]  }
   0x2   :  { %9 = vrot.lane.b32.xlu0 %v38_v0, %s45_s10  ;;  %v40_v2 = vld [vmem:[%s76_s0 + $0x1] ss:$4 sm:%s21_s11]   ;;  %s2_s16 = smov 3  ;;  %s46_s17 = smov 32  }
   0x3   :  { %23 = vrot.lane.b32.xlu1 %v40_v2, %s46_s17  ;;  %v3_v3 = vld [vmem:[%s76_s0] ss:$4 sm:%s2_s16]   ;;  %s47_s0 = smov 64  }
   0x4   :  { %5 = vst.msk [vmem:[#allocation0] ss:$8 sm:$0x3] %vm4_vm0, %v3_v3  }
   0x6   :  { %16 = vrot.lane.b32.xlu0 %v39_v1, %s47_s0 }
  0x74   :  { %v10_v4 = vpop.permute.xlu0 %9  }
  0x75   :  { %12 = vst.msk [vmem:[#allocation0] ss:$8 sm:$0x3] %vm11_vm1, %v10_v4   ;;  %v24_v5 = vpop.permute.xlu1 %23  }
  0x78   :  { %v17_v6 = vpop.permute.xlu0 %16  }
  0x79   :  { %19 = vst.msk [vmem:[#allocation0] ss:$8 sm:$0x3] %vm18_vm2, %v17_v6  }
  0x7a   :  { %26 = vst.msk [vmem:[#allocation0] ss:$8 sm:$0x3] %vm25_vm3, %v24_v5  }
  0x81   :  { %v30_v7 = vld [vmem:[#allocation0] sm:$0x1]  ;;  %v34_v8 = vld [vmem:[#allocation0 + $0x8] sm:$0x1] }
  0x82   :  { %32 = vst [vmem:[%s77_s1] sm:$0x1] %v30_v7  ;;  %41 = vst [vmem:[%s77_s1 + $0x1] sm:$0x1] %v34_v8 }

// kernel: gru_forward.1
= control target key start
LH: loop header
LB: loop body
LE: loop exit
PB: predicated region body
PF: predicated region fallthrough
CT: control target
= control target key end

     0   :  { %s1320_s24 = smov 0   ;;  %s1965_s0 = inlined_call_operand.vmem [shape: f32[8,2,8], index: 0, kind: input, shape index: {}]   ;;  %s1966_s1 = inlined_call_operand.vmem [shape: f32[256,512], index: 1, kind: input, shape index: {}]   ;;  %s1967_s2 = inlined_call_operand.vmem [shape: f32[8,512], index: 2, kind: input, shape index: {}]   ;;  %s1968_s3 = inlined_call_operand.vmem [shape: f32[1,512], index: 3, kind: input, shape index: {}]   ;;  %s1969_s4 = inlined_call_operand.vmem [shape: f32[256,256], index: 4, kind: input, shape index: {}]   ;;  %s1970_s5 = inlined_call_operand.vmem [shape: f32[8,256], index: 5, kind: input, shape index: {}]   ;;  %s1971_s6 = inlined_call_operand.vmem [shape: f32[1,256], index: 6, kind: input, shape index: {}]   ;;  %s1972_s7 = inlined_call_operand.vmem [shape: f32[2,256], index: 7, kind: output, shape index: {}]  }
   0x1 LB: > { %s1024_s25 = sadd.s32 4294967295, %s1276_s24   ;;  %p1027_p0 = scmp.ge.s32.totalorder %s1276_s24, 1  ;;  %s1276_s24 = sphi %s1320_s24, %s17_s24  }
   0x2   : > { %p231_p1 = scmp.lt.s32.totalorder %s1276_s24, 9 }
   0x4   : > { %p232_p2 = pnand %p1027_p0, %p231_p1 }
   0x5   : > { %p257_p3 = scmp.lt.s32.totalorder (!%p232_p2), %s1024_s25, 7  ;;  %p1029_p4 = scmp.ne.s32.totalorder (!%p232_p2), %s1024_s25, 0 }
   0x6   : > { %235 = sbr.rel (%p232_p2) target bundleno = 569 (0x239), region = 48 }
   0xd   : > { %s258_s26 = scalar_select %p257_p3, %s1024_s25, 7 }
   0xe   : > { %264 = sbr.rel (%p1029_p4) target bundleno = 21 (0x15), region = 52  ;;  %v1278_v0 = vmov (!%p1029_p4), 0.0  }
   0xf   : > { %s1028_s27 = sshll.u32 %s258_s26, 1  ;;  %265 = vst [vmem:[#allocation2] sm:$0xf] (!%p1029_p4), %v1278_v0 }
  0x10   : > { %s1331_s30 = scalar_lea.vmem %s1965_s0, %s1028_s27 }
  0x15 PF: > { %v269_v1 = vld [vmem:[%s1966_s1 + $0x8] sm:$0xff]  ;;  %v268_v3 = vld [vmem:[%s1966_s1] sm:$0xff]  ;;  %v1279_v8 = vmov 0.0   ;;  %vm400_vm0 = vcmask 64512  }
  0x16   : > { %v273_v2 = vld [vmem:[%s1966_s1 + $0x28] sm:$0xff]  ;;  %v272_v5 = vld [vmem:[%s1966_s1 + $0x20] sm:$0xff]  ;;  %468 = vmatprep.mubr.f32.mxu0 %v1279_v8 }
  0x17   : > { %v1042_v4 = vpack.c.bf16 %v273_v2, %v269_v1  ;;  %v277_v6 = vld [vmem:[%s1966_s1 + $0x48] sm:$0xff]  ;;  %v1044_v9 = vpack.c.bf16 %v272_v5, %v268_v3  ;;  %v276_v11 = vld [vmem:[%s1966_s1 + $0x40] sm:$0xff] }
  0x18   : > { %v281_v7 = vld [vmem:[%s1966_s1 + $0x68] sm:$0xff]  ;;  %v280_v12 = vld [vmem:[%s1966_s1 + $0x60] sm:$0xff] }
  0x19   : > { %v1046_v10 = vpack.c.bf16 %v281_v7, %v277_v6  ;;  %v285_v13 = vld [vmem:[%s1966_s1 + $0x88] sm:$0xff]  ;;  %1043 = vmatprep.subr.bf16.mxu1 %v1042_v4  ;;  %v1048_v15 = vpack.c.bf16 %v280_v12, %v276_v11  ;;  %v284_v17 = vld [vmem:[%s1966_s1 + $0x80] sm:$0xff] }
  0x1a   : > { %v289_v14 = vld [vmem:[%s1966_s1 + $0xa8] sm:$0xff]  ;;  %1045 = vmatpush1.bf16.msra.mxu1 %v1044_v9  ;;  %v288_v18 = vld [vmem:[%s1966_s1 + $0xa0] sm:$0xff] }
  0x1b   : > { %1047 = vmatprep.subr.bf16.mxu1 %v1046_v10  ;;  %v1050_v16 = vpack.c.bf16 %v289_v14, %v285_v13  ;;  %v293_v19 = vld [vmem:[%s1966_s1 + $0xc8] sm:$0xff]  ;;  %v1052_v21 = vpack.c.bf16 %v288_v18, %v284_v17  ;;  %v292_v23 = vld [vmem:[%s1966_s1 + $0xc0] sm:$0xff] }
  0x1c   : > { %v297_v20 = vld [vmem:[%s1966_s1 + $0xe8] sm:$0xff]  ;;  %v296_v24 = vld [vmem:[%s1966_s1 + $0xe0] sm:$0xff] }
  0x1d   : > { %v1054_v22 = vpack.c.bf16 %v297_v20, %v293_v19  ;;  %v301_v25 = vld [vmem:[%s1966_s1 + $0x108] sm:$0xff]  ;;  %v1056_v27 = vpack.c.bf16 %v296_v24, %v292_v23  ;;  %v300_v29 = vld [vmem:[%s1966_s1 + $0x100] sm:$0xff]  ;;  %v399_v19 = vld [vmem:[%s1967_s2 + $0x18] sm:$0xff] }
  0x1e   : > { %1049 = vmatpush1.bf16.msra.mxu1 %v1048_v15  ;;  %v305_v26 = vld [vmem:[%s1966_s1 + $0x128] sm:$0xff]  ;;  %v304_v30 = vld [vmem:[%s1966_s1 + $0x120] sm:$0xff]  ;;  %v398_v23 = vld [vmem:[%s1967_s2 + $0x10] sm:$0xff] }
  0x1f   : > { %1051 = vmatprep.subr.bf16.mxu1 %v1050_v16  ;;  %v1058_v28 = vpack.c.bf16 %v305_v26, %v301_v25  ;;  %v309_v31 = vld [vmem:[%s1966_s1 + $0x148] sm:$0xff]  ;;  %v1060_v33 = vpack.c.bf16 %v304_v30, %v300_v29  ;;  %v308_v35 = vld [vmem:[%s1966_s1 + $0x140] sm:$0xff]  ;;  %v753_v30 = vld [vmem:[%s1969_s4 + $0x10] sm:$0xff] }
  0x20   : > { %v313_v32 = vld [vmem:[%s1966_s1 + $0x168] sm:$0xff]  ;;  %v312_v36 = vld [vmem:[%s1966_s1 + $0x160] sm:$0xff] }
  0x21   : > { %v1062_v34 = vpack.c.bf16 %v313_v32, %v309_v31  ;;  %v317_v37 = vld [vmem:[%s1966_s1 + $0x188] sm:$0xff]  ;;  %v1064_v39 = vpack.c.bf16 %v312_v36, %v308_v35  ;;  %v316_v40 = vld [vmem:[%s1966_s1 + $0x180] sm:$0xff] }
  0x22   : > { %1053 = vmatpush1.bf16.msra.mxu1 %v1052_v21  ;;  %v321_v38 = vld [vmem:[%s1966_s1 + $0x1a8] sm:$0xff]  ;;  %v320_v41 = vld [vmem:[%s1966_s1 + $0x1a0] sm:$0xff] }
  0x23   : > { %1055 = vmatprep.subr.bf16.mxu1 %v1054_v22  ;;  %v397_v42 = vld [vmem:[%s1967_s2 + $0x8] sm:$0xff]  ;;  %v1066_v43 = vpack.c.bf16 %v321_v38, %v317_v37  ;;  %v396_v46 = vld [vmem:[%s1967_s2] sm:$0xff]  ;;  %v1068_v50 = vpack.c.bf16 %v320_v41, %v316_v40  ;;  %v757_v38 = vld [vmem:[%s1969_s4 + $0x30] sm:$0xff] }
  0x24   : > { %v325_v44 = vld [vmem:[%s1966_s1 + $0x1c8] sm:$0xff]  ;;  %404 = vmatprep.subr.mxu0 %v397_v42  ;;  %v1431_v47 = vld [vmem:[%s1331_s30] sm:$0x3]  ;;  %v762_v42 = vld [vmem:[%s1969_s4 + $0x58] sm:$0xff] }
  0x25   : > { %v329_v45 = vld [vmem:[%s1966_s1 + $0x1e8] sm:$0xff]  ;;  %405 = vmatpush1.msra.mxu0 %v396_v46  ;;  %v1433_v48 = vld.sshfl [vmem:[#allocation2] sm:$0x33 pattern:$0x76325410] }
  0x26   : > { %1057 = vmatpush1.bf16.msra.mxu1 %v1056_v27  ;;  %1030 = vmatmul.mubr.msk.f32.vlgmr.msra.gmra.mrb[0].mxu0 %vm400_vm0, %v1431_v47  ;;  %v1439_v49 = vcombine.high %v1433_v48, %v1433_v48  ;;  %v1070_v51 = vpack.c.bf16 %v329_v45, %v325_v44  ;;  %v324_v52 = vld [vmem:[%s1966_s1 + $0x1c0] sm:$0xff]  ;;  %v333_v54 = vld [vmem:[%s1966_s1 + $0x208] sm:$0xff] }
  0x27   : > { %1059 = vmatprep.subr.bf16.mxu1 %v1058_v28  ;;  %539 = vmatprep.mubr.f32.mxu0 %v1279_v8  ;;  %v328_v53 = vld [vmem:[%s1966_s1 + $0x1e0] sm:$0xff]  ;;  %v337_v55 = vld [vmem:[%s1966_s1 + $0x228] sm:$0xff]  ;;  %v754_v28 = vld [vmem:[%s1969_s4 + $0x18] sm:$0xff] }
  0x28   : > { %621 = vmatprep.mubr.f32.mxu1 %v1439_v49  ;;  %v1072_v56 = vpack.c.bf16 %v328_v53, %v324_v52  ;;  %v1074_v57 = vpack.c.bf16 %v337_v55, %v333_v54  ;;  %v332_v58 = vld [vmem:[%s1966_s1 + $0x200] sm:$0xff]  ;;  %v341_v60 = vld [vmem:[%s1966_s1 + $0x248] sm:$0xff]  ;;  %475 = vmatprep.subr.mxu0 %v399_v19  ;;  %v761_v53 = vld [vmem:[%s1969_s4 + $0x50] sm:$0xff] }
  0x29   : > { %v336_v59 = vld [vmem:[%s1966_s1 + $0x220] sm:$0xff]  ;;  %v345_v61 = vld [vmem:[%s1966_s1 + $0x268] sm:$0xff]  ;;  %476 = vmatpush1.msra.mxu0 %v398_v23  ;;  %v774_v19 = vld [vmem:[%s1969_s4 + $0xb8] sm:$0xff] }
  0x2a   : > { %1061 = vmatpush1.bf16.msra.mxu1 %v1060_v33  ;;  %v1076_v62 = vpack.c.bf16 %v336_v59, %v332_v58  ;;  %v1078_v63 = vpack.c.bf16 %v345_v61, %v341_v60  ;;  %v340_v0 = vld [vmem:[%s1966_s1 + $0x240] sm:$0xff]  ;;  %v349_v2 = vld [vmem:[%s1966_s1 + $0x288] sm:$0xff]  ;;  %1031 = vmatmul.mubr.msk.f32.vlgmr.msra.gmra.mrb[2].mxu0 %vm400_vm0, %v1431_v47 }
  0x2b   : > { %1063 = vmatprep.subr.bf16.mxu1 %v1062_v34  ;;  %v344_v1 = vld [vmem:[%s1966_s1 + $0x260] sm:$0xff]  ;;  %v353_v3 = vld [vmem:[%s1966_s1 + $0x2a8] sm:$0xff]  ;;  %881 = vmatprep.mubr.f32.mxu0 %v1279_v8  ;;  %v758_v34 = vld [vmem:[%s1969_s4 + $0x38] sm:$0xff] }
  0x2c   : > { %v1080_v4 = vpack.c.bf16 %v344_v1, %v340_v0  ;;  %v1082_v5 = vpack.c.bf16 %v353_v3, %v349_v2  ;;  %v348_v6 = vld [vmem:[%s1966_s1 + $0x280] sm:$0xff]  ;;  %v357_v9 = vld [vmem:[%s1966_s1 + $0x2c8] sm:$0xff]  ;;  %v765_v0 = vld [vmem:[%s1969_s4 + $0x70] sm:$0xff] }
  0x2d   : > { %v352_v7 = vld [vmem:[%s1966_s1 + $0x2a0] sm:$0xff]  ;;  %v361_v10 = vld [vmem:[%s1966_s1 + $0x2e8] sm:$0xff] }
  0x2e   : > { %1065 = vmatpush1.bf16.msra.mxu1 %v1064_v39  ;;  %v1084_v11 = vpack.c.bf16 %v352_v7, %v348_v6  ;;  %v1086_v12 = vpack.c.bf16 %v361_v10, %v357_v9  ;;  %v356_v13 = vld [vmem:[%s1966_s1 + $0x2c0] sm:$0xff]  ;;  %v365_v15 = vld [vmem:[%s1966_s1 + $0x308] sm:$0xff]  ;;  %v275_v6 = vld [vmem:[%s1966_s1 + $0x38] sm:$0xff] }
  0x2f   : > { %1067 = vmatprep.subr.bf16.mxu1 %v1066_v43  ;;  %v360_v14 = vld [vmem:[%s1966_s1 + $0x2e0] sm:$0xff]  ;;  %v369_v16 = vld [vmem:[%s1966_s1 + $0x328] sm:$0xff] }
  0x30   : > { %v364_v17 = vld [vmem:[%s1966_s1 + $0x300] sm:$0xff]  ;;  %v1088_v20 = vpack.c.bf16 %v360_v14, %v356_v13  ;;  %v373_v21 = vld [vmem:[%s1966_s1 + $0x348] sm:$0xff]  ;;  %v1090_v24 = vpack.c.bf16 %v369_v16, %v365_v15  ;;  %v270_v14 = vld [vmem:[%s1966_s1 + $0x10] sm:$0xff] }
  0x31   : > { %v368_v18 = vld [vmem:[%s1966_s1 + $0x320] sm:$0xff]  ;;  %v377_v22 = vld [vmem:[%s1966_s1 + $0x368] sm:$0xff]  ;;  %v274_v15 = vld [vmem:[%s1966_s1 + $0x30] sm:$0xff] }
  0x32   : > { %1069 = vmatpush1.bf16.msra.mxu1 %v1068_v50  ;;  %v816_v25 = vld [vmem:[%s1970_s5 + $0x8] sm:$0xff]  ;;  %v815_v26 = vld [vmem:[%s1970_s5] sm:$0xff]  ;;  %v1092_v35 = vpack.c.bf16 %v368_v18, %v364_v17  ;;  %v1094_v39 = vpack.c.bf16 %v377_v22, %v373_v21  ;;  %v279_v16 = vld [vmem:[%s1966_s1 + $0x58] sm:$0xff]  ;;  %v1108_v21 = vpack.c.bf16 %v274_v15, %v270_v14 }
  0x33   : > { %1071 = vmatprep.subr.bf16.mxu1 %v1070_v51  ;;  %v752_v27 = vld [vmem:[%s1969_s4 + $0x8] sm:$0xff]  ;;  %817 = vmatprep.subr.mxu0 %v816_v25  ;;  %v751_v29 = vld [vmem:[%s1969_s4] sm:$0xff]  ;;  %v283_v17 = vld [vmem:[%s1966_s1 + $0x78] sm:$0xff] }
  0x34   : > { %818 = vmatpush1.msra.mxu0 %v815_v26  ;;  %v1170_v31 = vpack.c.bf16 %v754_v28, %v752_v27  ;;  %v1172_v32 = vpack.c.bf16 %v753_v30, %v751_v29  ;;  %v756_v33 = vld [vmem:[%s1969_s4 + $0x28] sm:$0xff]  ;;  %v372_v36 = vld [vmem:[%s1966_s1 + $0x340] sm:$0xff]  ;;  %v278_v22 = vld [vmem:[%s1966_s1 + $0x50] sm:$0xff]  ;;  %v1110_v25 = vpack.c.bf16 %v283_v17, %v279_v16 }
  0x35   : > { %v1174_v37 = vpack.c.bf16 %v758_v34, %v756_v33  ;;  %v755_v8 = vld [vmem:[%s1969_s4 + $0x20] sm:$0xff]  ;;  %v760_v41 = vld [vmem:[%s1969_s4 + $0x48] sm:$0xff]  ;;  %1037 = vmatmul.mubr.msk.f32.vlgmr.msra.gmra.mrb[4].mxu0 %vm400_vm0, %v1431_v47  ;;  %v282_v26 = vld [vmem:[%s1966_s1 + $0x70] sm:$0xff] }
  0x36   : > { %1073 = vmatpush1.bf16.msra.mxu1 %v1072_v56  ;;  %v376_v40 = vld [vmem:[%s1966_s1 + $0x360] sm:$0xff]  ;;  %1171 = vmatprep.subr.bf16.mxu0 %v1170_v31  ;;  %v381_v43 = vld [vmem:[%s1966_s1 + $0x388] sm:$0xff]  ;;  %v1176_v45 = vpack.c.bf16 %v757_v38, %v755_v8  ;;  %v1178_v51 = vpack.c.bf16 %v762_v42, %v760_v41  ;;  %v766_v56 = vld [vmem:[%s1969_s4 + $0x78] sm:$0xff]  ;;  %v1112_v33 = vpack.c.bf16 %v282_v26, %v278_v22 }
  0x37   : > { %1075 = vmatprep.subr.bf16.mxu1 %v1074_v57  ;;  %v385_v44 = vld [vmem:[%s1966_s1 + $0x3a8] sm:$0xff]  ;;  %1173 = vmatpush1.bf16.msra.mxu0 %v1172_v32  ;;  %v1096_v46 = vpack.c.bf16 %v376_v40, %v372_v36  ;;  %v380_v50 = vld [vmem:[%s1966_s1 + $0x380] sm:$0xff]  ;;  %v778_v29 = vld [vmem:[%s1969_s4 + $0xd8] sm:$0xff] }
  0x38   : > { %1175 = vmatprep.subr.bf16.mxu0 %v1174_v37  ;;  %v759_v52 = vld [vmem:[%s1969_s4 + $0x40] sm:$0xff]  ;;  %v1098_v47 = vpack.c.bf16 %v385_v44, %v381_v43  ;;  %v764_v55 = vld [vmem:[%s1969_s4 + $0x68] sm:$0xff]  ;;  %v287_v30 = vld [vmem:[%s1966_s1 + $0x98] sm:$0xff] }
  0x39   : > { %v384_v54 = vld [vmem:[%s1966_s1 + $0x3a0] sm:$0xff]  ;;  %v389_v57 = vld [vmem:[%s1966_s1 + $0x3c8] sm:$0xff]  ;;  %v1180_v59 = vpack.c.bf16 %v761_v53, %v759_v52  ;;  %v291_v31 = vld [vmem:[%s1966_s1 + $0xb8] sm:$0xff] }
  0x3a   : > { %1077 = vmatpush1.bf16.msra.mxu1 %v1076_v62  ;;  %v393_v58 = vld [vmem:[%s1966_s1 + $0x3e8] sm:$0xff]  ;;  %v1100_v60 = vpack.c.bf16 %v384_v54, %v380_v50  ;;  %v388_v61 = vld [vmem:[%s1966_s1 + $0x3c0] sm:$0xff]  ;;  %v1182_v62 = vpack.c.bf16 %v766_v56, %v764_v55  ;;  %v777_v36 = vld [vmem:[%s1969_s4 + $0xd0] sm:$0xff]  ;;  %v1114_v37 = vpack.c.bf16 %v291_v31, %v287_v30 }
  0x3b   : > { %1079 = vmatprep.subr.bf16.mxu1 %v1078_v63  ;;  %1177 = vmatpush1.bf16.msra.mxu0 %v1176_v45  ;;  %v763_v63 = vld [vmem:[%s1969_s4 + $0x60] sm:$0xff]  ;;  %v1102_v1 = vpack.c.bf16 %v393_v58, %v389_v57  ;;  %v768_v3 = vld [vmem:[%s1969_s4 + $0x88] sm:$0xff]  ;;  %v286_v8 = vld [vmem:[%s1966_s1 + $0x90] sm:$0xff] }
  0x3c   : > { %1179 = vmatprep.subr.bf16.mxu0 %v1178_v51  ;;  %v392_v2 = vld [vmem:[%s1966_s1 + $0x3e0] sm:$0xff]  ;;  %v1184_v7 = vpack.c.bf16 %v765_v0, %v763_v63  ;;  %v772_v18 = vld [vmem:[%s1969_s4 + $0xa8] sm:$0xff]  ;;  %v290_v38 = vld [vmem:[%s1966_s1 + $0xb0] sm:$0xff] }
  0x3d   : > { %v1104_v9 = vpack.c.bf16 %v392_v2, %v388_v61  ;;  %v771_v23 = vld [vmem:[%s1969_s4 + $0xa0] sm:$0xff]  ;;  %v1190_v27 = vpack.c.bf16 %v774_v19, %v772_v18  ;;  %v776_v28 = vld [vmem:[%s1969_s4 + $0xc8] sm:$0xff]  ;;  %v299_v40 = vld [vmem:[%s1966_s1 + $0xf8] sm:$0xff]  ;;  %v1116_v42 = vpack.c.bf16 %v290_v38, %v286_v8 }
  0x3e   : > { %1081 = vmatpush1.bf16.msra.mxu1 %v1080_v4  ;;  %v770_v4 = vld [vmem:[%s1969_s4 + $0x98] sm:$0xff]  ;;  %v1194_v34 = vpack.c.bf16 %v778_v29, %v776_v28  ;;  %v294_v44 = vld [vmem:[%s1966_s1 + $0xd0] sm:$0xff] }
  0x3f   : > { %1083 = vmatprep.subr.bf16.mxu1 %v1082_v5  ;;  %v271_v5 = vld [vmem:[%s1966_s1 + $0x18] sm:$0xff]  ;;  %1181 = vmatpush1.bf16.msra.mxu0 %v1180_v59  ;;  %v1186_v10 = vpack.c.bf16 %v770_v4, %v768_v3  ;;  %v298_v45 = vld [vmem:[%s1966_s1 + $0xf0] sm:$0xff] }
  0x40   : > { %1183 = vmatprep.subr.bf16.mxu0 %v1182_v62  ;;  %v1106_v13 = vpack.c.bf16 %v275_v6, %v271_v5  ;;  %v307_v50 = vld [vmem:[%s1966_s1 + $0x138] sm:$0xff]  ;;  %v1120_v51 = vpack.c.bf16 %v298_v45, %v294_v44  ;;  %v302_v53 = vld [vmem:[%s1966_s1 + $0x110] sm:$0xff] }
  0x41   : > { %v311_v54 = vld [vmem:[%s1966_s1 + $0x158] sm:$0xff]  ;;  %v310_v58 = vld [vmem:[%s1966_s1 + $0x150] sm:$0xff] }
  0x42   : > { %1085 = vmatpush1.bf16.msra.mxu1 %v1084_v11  ;;  %v767_v11 = vld [vmem:[%s1969_s4 + $0x80] sm:$0xff]  ;;  %v315_v55 = vld [vmem:[%s1966_s1 + $0x178] sm:$0xff]  ;;  %v314_v59 = vld [vmem:[%s1966_s1 + $0x170] sm:$0xff] }
  0x43   : > { %1087 = vmatprep.subr.bf16.mxu1 %v1086_v12  ;;  %v769_v12 = vld [vmem:[%s1969_s4 + $0x90] sm:$0xff]  ;;  %1185 = vmatpush1.bf16.msra.mxu0 %v1184_v7  ;;  %v1126_v57 = vpack.c.bf16 %v315_v55, %v311_v54  ;;  %v323_v61 = vld [vmem:[%s1966_s1 + $0x1b8] sm:$0xff]  ;;  %v1128_v62 = vpack.c.bf16 %v314_v59, %v310_v58 }
  0x44   : > { %1187 = vmatprep.subr.bf16.mxu0 %v1186_v10  ;;  %v318_v0 = vld [vmem:[%s1966_s1 + $0x190] sm:$0xff]  ;;  %v327_v2 = vld [vmem:[%s1966_s1 + $0x1d8] sm:$0xff] }
  0x45   : > { %v331_v3 = vld [vmem:[%s1966_s1 + $0x1f8] sm:$0xff]  ;;  %v326_v6 = vld [vmem:[%s1966_s1 + $0x1d0] sm:$0xff] }
  0x46   : > { %1089 = vmatpush1.bf16.msra.mxu1 %v1088_v20  ;;  %v1188_v20 = vpack.c.bf16 %v769_v12, %v767_v11  ;;  %v1134_v5 = vpack.c.bf16 %v331_v3, %v327_v2  ;;  %v330_v7 = vld [vmem:[%s1966_s1 + $0x1f0] sm:$0xff]  ;;  %v339_v10 = vld [vmem:[%s1966_s1 + $0x238] sm:$0xff] }
  0x47   : > { %1091 = vmatprep.subr.bf16.mxu1 %v1090_v24  ;;  %v773_v24 = vld [vmem:[%s1969_s4 + $0xb0] sm:$0xff]  ;;  %v1136_v11 = vpack.c.bf16 %v330_v7, %v326_v6  ;;  %v343_v15 = vld [vmem:[%s1966_s1 + $0x258] sm:$0xff]  ;;  %v788_v7 = vld [vmem:[%s1969_s4 + $0x128] sm:$0xff] }
  0x48   : > { %1189 = vmatpush1.bf16.msra.mxu0 %v1188_v20  ;;  %v1192_v32 = vpack.c.bf16 %v773_v24, %v771_v23  ;;  %v338_v14 = vld [vmem:[%s1966_s1 + $0x230] sm:$0xff]  ;;  %v347_v16 = vld [vmem:[%s1966_s1 + $0x278] sm:$0xff] }
  0x49   : > { %1191 = vmatprep.subr.bf16.mxu0 %v1190_v27  ;;  %v1142_v18 = vpack.c.bf16 %v347_v16, %v343_v15  ;;  %v342_v19 = vld [vmem:[%s1966_s1 + $0x250] sm:$0xff]  ;;  %v355_v22 = vld [vmem:[%s1966_s1 + $0x2b8] sm:$0xff] }
  0x4a   : > { %1093 = vmatpush1.bf16.msra.mxu1 %v1092_v35  ;;  %v775_v35 = vld [vmem:[%s1969_s4 + $0xc0] sm:$0xff]  ;;  %v346_v20 = vld [vmem:[%s1966_s1 + $0x270] sm:$0xff]  ;;  %v359_v27 = vld [vmem:[%s1966_s1 + $0x2d8] sm:$0xff] }
  0x4b   : > { %1095 = vmatprep.subr.bf16.mxu1 %v1094_v39  ;;  %v295_v39 = vld [vmem:[%s1966_s1 + $0xd8] sm:$0xff]  ;;  %v1196_v41 = vpack.c.bf16 %v777_v36, %v775_v35  ;;  %v1144_v23 = vpack.c.bf16 %v346_v20, %v342_v19  ;;  %v354_v26 = vld [vmem:[%s1966_s1 + $0x2b0] sm:$0xff]  ;;  %v780_v35 = vld [vmem:[%s1969_s4 + $0xe8] sm:$0xff] }
  0x4c   : > { %1193 = vmatpush1.bf16.msra.mxu0 %v1192_v32  ;;  %v1118_v43 = vpack.c.bf16 %v299_v40, %v295_v39  ;;  %v363_v28 = vld [vmem:[%s1966_s1 + $0x2f8] sm:$0xff]  ;;  %v358_v31 = vld [vmem:[%s1966_s1 + $0x2d0] sm:$0xff]  ;;  %v796_v20 = vld [vmem:[%s1969_s4 + $0x168] sm:$0xff] }
  0x4d   : > { %1195 = vmatprep.subr.bf16.mxu0 %v1194_v34  ;;  %v1150_v30 = vpack.c.bf16 %v363_v28, %v359_v27  ;;  %v362_v32 = vld [vmem:[%s1966_s1 + $0x2f0] sm:$0xff]  ;;  %v371_v34 = vld [vmem:[%s1966_s1 + $0x338] sm:$0xff] }
  0x4e   : > { %1097 = vmatpush1.bf16.msra.mxu1 %v1096_v46  ;;  %v303_v46 = vld [vmem:[%s1966_s1 + $0x118] sm:$0xff]  ;;  %v1152_v8 = vpack.c.bf16 %v362_v32, %v358_v31  ;;  %v366_v39 = vld [vmem:[%s1966_s1 + $0x310] sm:$0xff]  ;;  %v804_v32 = vld [vmem:[%s1969_s4 + $0x1a8] sm:$0xff] }
  0x4f   : > { %1099 = vmatprep.subr.bf16.mxu1 %v1098_v47  ;;  %v1122_v52 = vpack.c.bf16 %v307_v50, %v303_v46  ;;  %v306_v47 = vld [vmem:[%s1966_s1 + $0x130] sm:$0xff]  ;;  %v782_v36 = vld [vmem:[%s1969_s4 + $0xf8] sm:$0xff] }
  0x50   : > { %1197 = vmatpush1.bf16.msra.mxu0 %v1196_v41  ;;  %v1124_v56 = vpack.c.bf16 %v306_v47, %v302_v53  ;;  %v370_v40 = vld [vmem:[%s1966_s1 + $0x330] sm:$0xff]  ;;  %v375_v41 = vld [vmem:[%s1966_s1 + $0x358] sm:$0xff] }
  0x51   : > { %v374_v45 = vld [vmem:[%s1966_s1 + $0x350] sm:$0xff]  ;;  %v383_v50 = vld [vmem:[%s1966_s1 + $0x398] sm:$0xff] }
  0x52   : > { %1101 = vmatpush1.bf16.msra.mxu1 %v1100_v60  ;;  %v319_v60 = vld [vmem:[%s1966_s1 + $0x198] sm:$0xff]  ;;  %v378_v46 = vld [vmem:[%s1966_s1 + $0x370] sm:$0xff] }
  0x53   : > { %1103 = vmatprep.subr.bf16.mxu1 %v1102_v1  ;;  %v1130_v63 = vpack.c.bf16 %v323_v61, %v319_v60  ;;  %v322_v1 = vld [vmem:[%s1966_s1 + $0x1b0] sm:$0xff]  ;;  %v391_v55 = vld [vmem:[%s1966_s1 + $0x3d8] sm:$0xff] }
  0x54   : > { %v1132_v4 = vpack.c.bf16 %v322_v1, %v318_v0  ;;  %v382_v47 = vld [vmem:[%s1966_s1 + $0x390] sm:$0xff]  ;;  %v784_v1 = vld [vmem:[%s1969_s4 + $0x108] sm:$0xff]  ;;  %v786_v2 = vld [vmem:[%s1969_s4 + $0x118] sm:$0xff] }
  0x55   : > { %v386_v54 = vld [vmem:[%s1966_s1 + $0x3b0] sm:$0xff]  ;;  %v1202_v3 = vpack.c.bf16 %v786_v2, %v784_v1  ;;  %v794_v15 = vld [vmem:[%s1969_s4 + $0x158] sm:$0xff] }
  0x56   : > { %1105 = vmatpush1.bf16.msra.mxu1 %v1104_v9  ;;  %v335_v9 = vld [vmem:[%s1966_s1 + $0x218] sm:$0xff]  ;;  %v390_v59 = vld [vmem:[%s1966_s1 + $0x3d0] sm:$0xff] }
  0x57   : > { %1107 = vmatprep.subr.bf16.mxu1 %v1106_v13  ;;  %v1138_v12 = vpack.c.bf16 %v339_v10, %v335_v9  ;;  %v334_v13 = vld [vmem:[%s1966_s1 + $0x210] sm:$0xff]  ;;  %v790_v9 = vld [vmem:[%s1969_s4 + $0x138] sm:$0xff] }
  0x58   : > { %v1140_v17 = vpack.c.bf16 %v338_v14, %v334_v13  ;;  %v394_v60 = vld [vmem:[%s1966_s1 + $0x3f0] sm:$0xff]  ;;  %v1206_v10 = vpack.c.bf16 %v790_v9, %v788_v7  ;;  %v792_v14 = vld [vmem:[%s1969_s4 + $0x148] sm:$0xff]  ;;  %v802_v27 = vld [vmem:[%s1969_s4 + $0x198] sm:$0xff] }
  0x59   : > { %622 = vmatmul.mubr.f32.vlgmr.msra.gmra.mrb[0].mxu1 %v1433_v48  ;;  %v1168_v61 = vpack.c.bf16 %v394_v60, %v390_v59  ;;  %v1210_v16 = vpack.c.bf16 %v794_v15, %v792_v14 }
  0x5a   : > { %1109 = vmatpush1.bf16.msra.mxu1 %v1108_v21  ;;  %692 = vmatprep.mubr.f32.mxu1 %v1439_v49  ;;  %v351_v21 = vld [vmem:[%s1966_s1 + $0x298] sm:$0xff] }
  0x5b   : > { %1111 = vmatprep.subr.bf16.mxu1 %v1110_v25  ;;  %v1146_v24 = vpack.c.bf16 %v355_v22, %v351_v21  ;;  %v350_v25 = vld [vmem:[%s1966_s1 + $0x290] sm:$0xff]  ;;  %v798_v21 = vld [vmem:[%s1969_s4 + $0x178] sm:$0xff] }
  0x5c   : > { %v1148_v29 = vpack.c.bf16 %v354_v26, %v350_v25  ;;  %v1214_v22 = vpack.c.bf16 %v798_v21, %v796_v20  ;;  %v800_v26 = vld [vmem:[%s1969_s4 + $0x188] sm:$0xff] }
  0x5d   : > { %v1218_v28 = vpack.c.bf16 %v802_v27, %v800_v26 }
  0x5e   : > { %1113 = vmatpush1.bf16.msra.mxu1 %v1112_v33  ;;  %v367_v33 = vld [vmem:[%s1966_s1 + $0x318] sm:$0xff] }
  0x5f   : > { %1115 = vmatprep.subr.bf16.mxu1 %v1114_v37  ;;  %v1198_v37 = vpack.c.bf16 %v782_v36, %v780_v35  ;;  %v1154_v38 = vpack.c.bf16 %v371_v34, %v367_v33  ;;  %v806_v33 = vld [vmem:[%s1969_s4 + $0x1b8] sm:$0xff]  ;;  %v803_v35 = vld [vmem:[%s1969_s4 + $0x1a0] sm:$0xff]  ;;  %v805_v36 = vld [vmem:[%s1969_s4 + $0x1b0] sm:$0xff] }
  0x60   : > { %v1222_v34 = vpack.c.bf16 %v806_v33, %v804_v32 }
  0x61   : > { %1199 = vmatprep.subr.bf16.mxu0 %v1198_v37  ;;  %v808_v37 = vld [vmem:[%s1969_s4 + $0x1c8] sm:$0xff] }
  0x62   : > { %1117 = vmatpush1.bf16.msra.mxu1 %v1116_v42  ;;  %v379_v42 = vld [vmem:[%s1966_s1 + $0x378] sm:$0xff] }
  0x63   : > { %1119 = vmatprep.subr.bf16.mxu1 %v1118_v43  ;;  %v1156_v43 = vpack.c.bf16 %v370_v40, %v366_v39  ;;  %v1158_v44 = vpack.c.bf16 %v379_v42, %v375_v41  ;;  %v807_v39 = vld [vmem:[%s1969_s4 + $0x1c0] sm:$0xff]  ;;  %v809_v40 = vld [vmem:[%s1969_s4 + $0x1d0] sm:$0xff]  ;;  %v812_v42 = vld [vmem:[%s1969_s4 + $0x1e8] sm:$0xff] }
  0x66   : > { %1121 = vmatpush1.bf16.msra.mxu1 %v1120_v51  ;;  %v387_v51 = vld [vmem:[%s1966_s1 + $0x3b8] sm:$0xff] }
  0x67   : > { %1123 = vmatprep.subr.bf16.mxu1 %v1122_v52  ;;  %v1160_v52 = vpack.c.bf16 %v378_v46, %v374_v45  ;;  %v1162_v53 = vpack.c.bf16 %v387_v51, %v383_v50  ;;  %v811_v46 = vld [vmem:[%s1969_s4 + $0x1e0] sm:$0xff]  ;;  %v813_v50 = vld [vmem:[%s1969_s4 + $0x1f0] sm:$0xff] }
  0x68   : > { %v1232_v51 = vpack.c.bf16 %v813_v50, %v811_v46 }
  0x6a   : > { %1125 = vmatpush1.bf16.msra.mxu1 %v1124_v56  ;;  %v395_v56 = vld [vmem:[%s1966_s1 + $0x3f8] sm:$0xff] }
  0x6b   : > { %1127 = vmatprep.subr.bf16.mxu1 %v1126_v57  ;;  %v1164_v57 = vpack.c.bf16 %v386_v54, %v382_v47  ;;  %v1166_v58 = vpack.c.bf16 %v395_v56, %v391_v55  ;;  %v701_v55 = vlaneseq }
  0x6d   : > { %v702_v56 = vshrl.u32 %v701_v55, 7 }
  0x6e   : > { %1129 = vmatpush1.bf16.msra.mxu1 %v1128_v62  ;;  %v779_v62 = vld [vmem:[%s1969_s4 + $0xe0] sm:$0xff] }
  0x6f   : > { %1131 = vmatprep.subr.bf16.mxu1 %v1130_v63  ;;  %v781_v63 = vld [vmem:[%s1969_s4 + $0xf0] sm:$0xff]  ;;  %v707_v59 = vsub.s32 1, %v702_v56  ;;  %v715_v20 = vsub.s32 3, %v702_v56 }
  0x70   : > { %v1200_v0 = vpack.c.bf16 %v781_v63, %v779_v62 }
  0x72   : > { %1133 = vmatpush1.bf16.msra.mxu1 %v1132_v4  ;;  %1201 = vmatpush1.bf16.msra.mxu0 %v1200_v0  ;;  %v783_v4 = vld [vmem:[%s1969_s4 + $0x100] sm:$0xff] }
  0x73   : > { %1135 = vmatprep.subr.bf16.mxu1 %v1134_v5  ;;  %v785_v5 = vld [vmem:[%s1969_s4 + $0x110] sm:$0xff]  ;;  %1203 = vmatprep.subr.bf16.mxu0 %v1202_v3 }
  0x74   : > { %v1204_v6 = vpack.c.bf16 %v785_v5, %v783_v4 }
  0x76   : > { %1137 = vmatpush1.bf16.msra.mxu1 %v1136_v11  ;;  %1205 = vmatpush1.bf16.msra.mxu0 %v1204_v6  ;;  %v787_v11 = vld [vmem:[%s1969_s4 + $0x120] sm:$0xff] }
  0x77   : > { %1139 = vmatprep.subr.bf16.mxu1 %v1138_v12  ;;  %v789_v12 = vld [vmem:[%s1969_s4 + $0x130] sm:$0xff]  ;;  %1207 = vmatprep.subr.bf16.mxu0 %v1206_v10 }
  0x78   : > { %v1208_v13 = vpack.c.bf16 %v789_v12, %v787_v11 }
  0x7a   : > { %1141 = vmatpush1.bf16.msra.mxu1 %v1140_v17  ;;  %1209 = vmatpush1.bf16.msra.mxu0 %v1208_v13  ;;  %v791_v17 = vld [vmem:[%s1969_s4 + $0x140] sm:$0xff] }
  0x7b   : > { %1143 = vmatprep.subr.bf16.mxu1 %v1142_v18  ;;  %v793_v18 = vld [vmem:[%s1969_s4 + $0x150] sm:$0xff]  ;;  %1211 = vmatprep.subr.bf16.mxu0 %v1210_v16 }
  0x7c   : > { %v1212_v19 = vpack.c.bf16 %v793_v18, %v791_v17 }
  0x7e   : > { %1145 = vmatpush1.bf16.msra.mxu1 %v1144_v23  ;;  %1213 = vmatpush1.bf16.msra.mxu0 %v1212_v19  ;;  %v795_v23 = vld [vmem:[%s1969_s4 + $0x160] sm:$0xff]  ;;  %v711_v19 = vsub.s32 2, %v702_v56 }
  0x7f   : > { %1147 = vmatprep.subr.bf16.mxu1 %v1146_v24  ;;  %v797_v24 = vld [vmem:[%s1969_s4 + $0x170] sm:$0xff]  ;;  %1215 = vmatprep.subr.bf16.mxu0 %v1214_v22 }
  0x80   : > { %v1216_v25 = vpack.c.bf16 %v797_v24, %v795_v23 }
  0x82   : > { %1149 = vmatpush1.bf16.msra.mxu1 %v1148_v29  ;;  %1217 = vmatpush1.bf16.msra.mxu0 %v1216_v25  ;;  %v799_v29 = vld [vmem:[%s1969_s4 + $0x180] sm:$0xff] }
  0x83   : > { %1151 = vmatprep.subr.bf16.mxu1 %v1150_v30  ;;  %v801_v30 = vld [vmem:[%s1969_s4 + $0x190] sm:$0xff]  ;;  %1219 = vmatprep.subr.bf16.mxu0 %v1218_v28 }
  0x84   : > { %v1220_v31 = vpack.c.bf16 %v801_v30, %v799_v29  ;;  %v959_v29 = vld [vmem:[%s1971_s6] sm:$0x3] }
  0x85   : > { %v968_v33 = vrot.slane %v959_v29, %v707_v59 }
  0x86   : > { %1153 = vmatpush1.bf16.msra.mxu1 %v1152_v8  ;;  %1221 = vmatpush1.bf16.msra.mxu0 %v1220_v31  ;;  %v1224_v8 = vpack.c.bf16 %v805_v36, %v803_v35 }
  0x87   : > { %1155 = vmatprep.subr.bf16.mxu1 %v1154_v38  ;;  %v810_v38 = vld [vmem:[%s1969_s4 + $0x1d8] sm:$0xff]  ;;  %1223 = vmatprep.subr.bf16.mxu0 %v1222_v34 }
  0x88   : > { %v1226_v41 = vpack.c.bf16 %v810_v38, %v808_v37 }
  0x8a   : > { %1157 = vmatpush1.bf16.msra.mxu1 %v1156_v43  ;;  %v814_v43 = vld [vmem:[%s1969_s4 + $0x1f8] sm:$0xff]  ;;  %1225 = vmatpush1.bf16.msra.mxu0 %v1224_v8 }
  0x8b   : > { %1159 = vmatprep.subr.bf16.mxu1 %v1158_v44  ;;  %v1228_v44 = vpack.c.bf16 %v809_v40, %v807_v39  ;;  %1227 = vmatprep.subr.bf16.mxu0 %v1226_v41  ;;  %v1230_v45 = vpack.c.bf16 %v814_v43, %v812_v42 }
  0x8e   : > { %1161 = vmatpush1.bf16.msra.mxu1 %v1160_v52  ;;  %1229 = vmatpush1.bf16.msra.mxu0 %v1228_v44 }
  0x8f   : > { %1163 = vmatprep.subr.bf16.mxu1 %v1162_v53  ;;  %1231 = vmatprep.subr.bf16.mxu0 %v1230_v45 }
  0x92   : > { %1165 = vmatpush1.bf16.msra.mxu1 %v1164_v57  ;;  %1233 = vmatpush1.bf16.msra.mxu0 %v1232_v51  ;;  %v703_v57 = vsub.s32 0, %v702_v56 }
  0x93   : > { %1167 = vmatprep.subr.bf16.mxu1 %v1166_v58  ;;  %v699_v58 = vld [vmem:[%s1968_s3] sm:$0xf] }
  0x94   : > { %v704_v60 = vrot.slane %v699_v58, %v703_v57  ;;  %v708_v62 = vrot.slane %v699_v58, %v707_v59  ;;  %v712_v21 = vrot.slane %v699_v58, %v711_v19  ;;  %v716_v22 = vrot.slane %v699_v58, %v715_v20 }
  0x95   : > { %v964_v32 = vrot.slane %v959_v29, %v703_v57 }
  0x96   : > { %1169 = vmatpush1.bf16.msra.mxu1 %v1168_v61 }
  0x99   : > { %693 = vmatmul.mubr.f32.vlgmr.msra.gmra.mrb[2].mxu1 %v1433_v48 }
  0xf9   : > { %v470_v52 = vpop.f32.mrb[0].mxu0 }
  0xfa   : > { %v472_v53 = vpop.f32.mrb[1].mxu0 }
  0xfd   : > { %v541_v47 = vpop.f32.mrb[2].mxu0 }
  0xfe   : > { %v543_v54 = vpop.f32.mrb[3].mxu0 }
 0x12c   : > { %v623_v61 = vpop.f32.mrb[0].mxu1 }
 0x12d   : > { %v624_v63 = vadd.f32 %v623_v61, %v470_v52  ;;  %v625_v0 = vpop.f32.mrb[1].mxu1 }
 0x12e   : > { %v626_v1 = vadd.f32 %v625_v0, %v472_v53 }
 0x12f   : > { %v721_v2 = vadd.f32 %v704_v60, %v624_v63 }
 0x130   : > { %v722_v3 = vadd.f32 %v708_v62, %v626_v1 }
 0x131   : > { %v1033_v4 = vmul.f32 -1.442695, %v721_v2 }
 0x132   : > { %v1034_v5 = vmul.f32 -1.442695, %v722_v3 }
 0x133   : > { %1250 = vpow2.f32 %v1033_v4 }
 0x134   : > { %1252 = vpow2.f32 %v1034_v5 }
 0x13d   : > { %v1251_v6 = vpop.eup %1250 }
 0x13e   : > { %v1253_v7 = vpop.eup %1252  ;;  %v737_v9 = vadd.f32 1.0, %v1251_v6 }
 0x13f   : > { %v738_v10 = vadd.f32 1.0, %v1253_v7 }
 0x140   : > { %1254 = vrcp.f32 %v737_v9 }
 0x141   : > { %1256 = vrcp.f32 %v738_v10 }
 0x14a   : > { %v1255_v11 = vpop.eup %1254 }
 0x14b   : > { %v1257_v12 = vpop.eup %1256  ;;  %v749_v14 = vmul.f32 %v1255_v11, %v1433_v48 }
 0x14c   : > { %v750_v13 = vmul.f32 %v1257_v12, %v1439_v49 }
 0x14e   : > { %952 = vmatprep.mubr.f32.mxu0 %v750_v13 }
 0x14f   : > { %953 = vmatmul.mubr.f32.vlgmr.msra.gmra.mrb[4].mxu0 %v749_v14 }
 0x16c   : > { %v694_v15 = vpop.f32.mrb[2].mxu1 }
 0x16d   : > { %v695_v16 = vadd.f32 %v694_v15, %v541_v47  ;;  %v696_v17 = vpop.f32.mrb[3].mxu1 }
 0x16e   : > { %v697_v18 = vadd.f32 %v696_v17, %v543_v54 }
 0x16f   : > { %v723_v23 = vadd.f32 %v712_v21, %v695_v16 }
 0x170   : > { %v724_v24 = vadd.f32 %v716_v22, %v697_v18 }
 0x171   : > { %v1035_v25 = vmul.f32 -1.442695, %v723_v23 }
 0x172   : > { %v1036_v26 = vmul.f32 -1.442695, %v724_v24 }
 0x173   : > { %1258 = vpow2.f32 %v1035_v25 }
 0x174   : > { %1260 = vpow2.f32 %v1036_v26 }
 0x17d   : > { %v1259_v27 = vpop.eup %1258 }
 0x17e   : > { %v1261_v28 = vpop.eup %1260  ;;  %v739_v30 = vadd.f32 1.0, %v1259_v27 }
 0x17f   : > { %v740_v31 = vadd.f32 1.0, %v1261_v28 }
 0x180   : > { %1262 = vrcp.f32 %v739_v30 }
 0x181   : > { %1264 = vrcp.f32 %v740_v31 }
 0x18a   : > { %v1263_v8 = vpop.eup %1262 }
 0x18b   : > { %v1265_v38 = vpop.eup %1264  ;;  %v977_v39 = vsub.f32 1.0, %v1263_v8  ;;  %v975_v43 = vmul.f32 %v1263_v8, %v1433_v48 }
 0x18c   : > { %v978_v41 = vsub.f32 1.0, %v1265_v38  ;;  %v976_v45 = vmul.f32 %v1265_v38, %v1439_v49 }
 0x222   : > { %v954_v34 = vpop.f32.mrb[4].mxu0 }
 0x223   : > { %v971_v35 = vadd.f32 %v964_v32, %v954_v34  ;;  %v956_v36 = vpop.f32.mrb[5].mxu0 }
 0x224   : > { %v972_v37 = vadd.f32 %v968_v33, %v956_v36 }
 0x225   : > { %1266 = vtanh.f32 %v971_v35 }
 0x226   : > { %1268 = vtanh.f32 %v972_v37 }
 0x22f   : > { %v1267_v40 = vpop.eup %1266 }
 0x230   : > { %v1269_v42 = vpop.eup %1268  ;;  %v979_v44 = vmul.f32 %v1267_v40, %v977_v39 }
 0x231   : > { %v980_v46 = vmul.f32 %v1269_v42, %v978_v41 }
 0x232   : > { %v981_v50 = vadd.f32 %v979_v44, %v975_v43 }
 0x233   : > { %v982_v51 = vadd.f32 %v980_v46, %v976_v45 }
 0x235   : > { %v985_v52 = vcombine.low %v981_v50, %v982_v51 }
 0x237   : > { %1038 = vst.sshfl [vmem:[#allocation2] sm:$0x33 pattern:$0x76325410] %v985_v52 }
 0x238   : > { %1039 = vst.sshfl [vmem:[%s1972_s7] sm:$0x33 pattern:$0x76325410] %v985_v52 }
 0x239 PF: > { %s17_s24 = sadd.s32 1, %s1276_s24  }
 0x23a   : > { %p14_p5 = scmp.ge.s32.totalorder %s17_s24, 10  }
 0x23c   :  { %16 = sbr.rel (!%p14_p5) target bundleno = 1 (0x1), region = 78 }

</bundles_post_ra>
